<compile_context>
chip_gen: v5e
topology: v5e:2x2
jax: 0.10.0
libtpu: 0.0.40
codegen_flags: <defaults>
</compile_context>

<pallas_src>
import jax
import jax.numpy as jnp
from jax.experimental import pallas as pl
from jax.experimental.pallas import tpu as pltpu


# Conservative tile budget: comfortably inside v7x's 64 MiB physical VMEM
# (and well inside v5e/v6e's 128 MiB), leaving headroom for compiler scratch.
_VMEM_TILE_BUDGET = 40 * 1024 * 1024


def _round_up(x, m):
    return (x + m - 1) // m * m


def _round_down(x, m):
    return max(m, (x // m) * m)


def _choose_tiles(M, K, N_pad, in_bytes, max_tm=None, max_tk=None):
    """Pick (tm, tk) so double-buffered tiles + f32 accumulator fit the budget."""
    sub = 8 if in_bytes >= 4 else 16          # sublane multiple (f32 / bf16)
    K_pad_full = _round_up(K, 128)            # lane-dim of x / sublane-dim of w

    # --- K tile ---------------------------------------------------------
    if max_tk is not None:
        tk = min(K_pad_full, max(_round_up(max_tk, 128), 128))
    elif K_pad_full * N_pad * in_bytes <= _VMEM_TILE_BUDGET // 2:
        tk = K_pad_full                       # whole (padded) weight stays resident
    else:
        tk = min(K_pad_full, 1024)            # stream the weight along K

    # --- row tile -------------------------------------------------------
    tm_cap = min(_round_up(M, sub), 512 if in_bytes >= 4 else 1024)
    if max_tm is not None:
        tm_cap = min(tm_cap, max(_round_up(max_tm, sub), sub))
    tm = tm_cap
    while True:
        need = (2 * tm * tk * in_bytes        # x tile, double buffered
                + 2 * tk * N_pad * in_bytes   # weight tile(s)
                + 2 * tm * N_pad * 4          # output tile, double buffered
                + tm * N_pad * 4)             # f32 accumulator scratch
        if need <= _VMEM_TILE_BUDGET or tm <= sub:
            break
        tm = _round_down(tm - sub, sub)
    return tm, tk


def _lr_kernel(x_ref, w_ref, b_ref, o_ref, acc_ref):
    k = pl.program_id(1)

    @pl.when(k == 0)
    def _init():
        acc_ref[...] = jnp.zeros_like(acc_ref)

    # ReLU on the streamed x tile, then MXU matmul with f32 accumulation.
    x = jnp.maximum(x_ref[...], 0.0)
    acc_ref[...] += jnp.dot(x, w_ref[...], preferred_element_type=jnp.float32)

    @pl.when(k == pl.num_programs(1) - 1)
    def _finalize():
        o_ref[...] = (acc_ref[...] + b_ref[...]).astype(o_ref.dtype)


def lr_forward(x, weight, bias, channel_number, output_size, *,
               compute_dtype=None, max_rows_per_tile=None, max_k_per_tile=None):
    """Equivalent of LR.forward.

    x:      any shape whose trailing elements flatten to channel_number*output_size
    weight: (output_size, channel_number*output_size)  (PyTorch Linear layout)
    bias:   (output_size,)
    compute_dtype: optional operand dtype for the matmul (e.g. jnp.bfloat16 on
                   v6e/v7x); accumulation and bias stay f32, output keeps x.dtype.
    """
    K = channel_number * output_size
    N = output_size
    x2 = x.reshape(-1, K)
    M = x2.shape[0]

    out_dtype = x2.dtype
    cdt = jnp.dtype(compute_dtype) if compute_dtype is not None else jnp.dtype(out_dtype)
    in_bytes = cdt.itemsize

    N_pad = _round_up(N, 128)                 # lane-dense output (unmasked stores)
    tm, tk = _choose_tiles(M, K, N_pad, in_bytes,
                           max_tm=max_rows_per_tile, max_tk=max_k_per_tile)
    M_pad = _round_up(M, tm)
    K_pad = _round_up(K, tk)

    # Zero padding is semantically neutral: relu(0)=0 and zero weight rows /
    # columns contribute nothing; padded output rows/cols are sliced off below.
    x2p = jnp.zeros((M_pad, K_pad), cdt).at[:M, :K].set(x2.astype(cdt))
    wTp = jnp.zeros((K_pad, N_pad), cdt).at[:K, :N].set(weight.T.astype(cdt))
    b2p = jnp.zeros((1, N_pad), jnp.float32).at[:, :N].set(bias.astype(jnp.float32))

    grid_m = M_pad // tm
    grid_k = K_pad // tk

    # VMEM limit derived from the actual tile sizes (+ headroom), capped for v7x.
    vmem_need = (2 * tm * tk * in_bytes
                 + 2 * tk * N_pad * in_bytes
                 + 2 * tm * N_pad * jnp.dtype(out_dtype).itemsize
                 + tm * N_pad * 4
                 + 2 * N_pad * 4)
    vmem_limit = int(min(64 * 1024 * 1024, max(vmem_need + (8 << 20), 16 << 20)))

    out = pl.pallas_call(
        _lr_kernel,
        out_shape=jax.ShapeDtypeStruct((M_pad, N_pad), out_dtype),
        grid_spec=pltpu.PrefetchScalarGridSpec(
            num_scalar_prefetch=0,
            grid=(grid_m, grid_k),
            in_specs=[
                pl.BlockSpec((tm, tk), lambda i, k: (i, k)),      # x tile (streamed)
                pl.BlockSpec((tk, N_pad), lambda i, k: (k, 0)),   # weight tile
                pl.BlockSpec((1, N_pad), lambda i, k: (0, 0)),    # bias (resident)
            ],
            out_specs=pl.BlockSpec((tm, N_pad), lambda i, k: (i, 0)),
            scratch_shapes=[pltpu.VMEM((tm, N_pad), jnp.float32)],
        ),
        compiler_params=pltpu.CompilerParams(
            dimension_semantics=("parallel", "arbitrary"),
            vmem_limit_bytes=vmem_limit,
        ),
    )(x2p, wTp, b2p)
    return out[:M, :N]


if __name__ == "__main__":
    # Small shapes consistent with the module: channel_number=4, output_size=64.
    channel_number = 4
    output_size = 64
    in_features = channel_number * output_size

    key = jax.random.PRNGKey(0)
    kx1, kx2, kw, kb = jax.random.split(key, 4)

    # Deterministic parameter init mimicking torch.nn.Linear's U(-1/sqrt(in), 1/sqrt(in)).
    bound = 1.0 / jnp.sqrt(jnp.float32(in_features))
    weight = jax.random.uniform(kw, (output_size, in_features), jnp.float32,
                                minval=-bound, maxval=bound)
    bias = jax.random.uniform(kb, (output_size,), jnp.float32,
                              minval=-bound, maxval=bound)

    def reference(x, op_dtype=None):
        xf = jnp.maximum(x.reshape(-1, in_features), 0.0)
        wt = weight.T
        if op_dtype is not None:
            xf = xf.astype(op_dtype)
            wt = wt.astype(op_dtype)
        return jnp.dot(xf, wt, preferred_element_type=jnp.float32) + bias

    # Case 1: small batch, f32 end-to-end, single grid step.
    x_a = jax.random.normal(kx1, (16, channel_number, output_size), jnp.float32)
    out_a = jax.block_until_ready(
        lr_forward(x_a, weight, bias, channel_number, output_size))
    assert out_a.shape == (16, output_size)
    assert jnp.allclose(out_a, reference(x_a), atol=1e-5, rtol=1e-5), "case1 mismatch"

    # Case 2: non-divisible batch with forced small row tile and a K-reduction
    # grid axis — exercises M padding, multi-step pipelining, and the f32
    # accumulator init/finalize path.
    x_b = jax.random.normal(kx2, (50, channel_number, output_size), jnp.float32)
    out_b = jax.block_until_ready(
        lr_forward(x_b, weight, bias, channel_number, output_size,
                   max_rows_per_tile=8, max_k_per_tile=128))
    assert out_b.shape == (50, output_size)
    assert jnp.allclose(out_b, reference(x_b), atol=1e-4, rtol=1e-4), "case2 mismatch"

    # Case 3: bf16 operands with f32 accumulation (v6e/v7x MXU fast path).
    out_c = jax.block_until_ready(
        lr_forward(x_a, weight, bias, channel_number, output_size,
                   compute_dtype=jnp.bfloat16))
    assert out_c.shape == (16, output_size)
    assert jnp.allclose(out_c, reference(x_a, jnp.bfloat16),
                        atol=5e-3, rtol=5e-3), "case3 mismatch"

    print("KERNEL_OK")
</pallas_src>

<mosaic_0001>
module attributes {stable_mosaic.version = 11 : i64} {
  func.func @_lr_kernel(%arg0: i32, %arg1: i32, %arg2: memref<16x256xf32, #tpu.memory_space<vmem>>, %arg3: memref<256x128xf32, #tpu.memory_space<vmem>>, %arg4: memref<1x128xf32, #tpu.memory_space<vmem>>, %arg5: memref<16x128xf32, #tpu.memory_space<vmem>>, %arg6: memref<16x128xf32, #tpu.memory_space<vmem>>) attributes {dimension_semantics = [#tpu.dimension_semantics<parallel>, #tpu.dimension_semantics<arbitrary>], iteration_bounds = array<i64: 1, 1>, scalar_prefetch = 0 : i64, scratch_operands = 1 : i64, tpu.core_type = #tpu.core_type<tc>, window_params = [{transform_indices = @transform_0, window_bounds = array<i64: 16, 256>}, {transform_indices = @transform_1, window_bounds = array<i64: 256, 128>}, {pipeline_mode = #tpu.pipeline_mode<synchronous>, transform_indices = @transform_2, window_bounds = array<i64: 1, 128>}, {transform_indices = @transform_3, window_bounds = array<i64: 16, 128>}]} {
    %c0_i32 = arith.constant 0 : i32
    %0 = arith.cmpi eq, %arg1, %c0_i32 : i32
    %1 = arith.extui %0 : i1 to i32
    %c0_i32_0 = arith.constant 0 : i32
    %2 = arith.cmpi ne, %1, %c0_i32_0 : i32
    scf.if %2 {
      %cst_11 = arith.constant 0.000000e+00 : f32
      %14 = vector.broadcast %cst_11 : f32 to vector<16x128xf32>
      %c0_12 = arith.constant 0 : index
      %c0_13 = arith.constant 0 : index
      %15 = vector.load %arg6[%c0_12, %c0_13] : memref<16x128xf32, #tpu.memory_space<vmem>>, vector<16x128xf32>
      tpu.vector_store %arg6[%c0_12, %c0_13], %14 {strides = array<i32>} : memref<16x128xf32, #tpu.memory_space<vmem>>, vector<16x128xf32>,
    } else {
    }
    %c0 = arith.constant 0 : index
    %c0_1 = arith.constant 0 : index
    %3 = vector.load %arg2[%c0, %c0_1] : memref<16x256xf32, #tpu.memory_space<vmem>>, vector<16x256xf32>
    %cst = arith.constant 0.000000e+00 : f32
    %4 = vector.broadcast %cst : f32 to vector<16x256xf32>
    %5 = arith.maximumf %3, %4 : vector<16x256xf32>
    %c0_2 = arith.constant 0 : index
    %c0_3 = arith.constant 0 : index
    %6 = vector.load %arg6[%c0_2, %c0_3] : memref<16x128xf32, #tpu.memory_space<vmem>>, vector<16x128xf32>
    %c0_4 = arith.constant 0 : index
    %c0_5 = arith.constant 0 : index
    %7 = vector.load %arg3[%c0_4, %c0_5] : memref<256x128xf32, #tpu.memory_space<vmem>>, vector<256x128xf32>
    %cst_6 = arith.constant dense<0.000000e+00> : vector<16x128xf32>
    %8 = tpu.matmul %5, %7, %cst_6 {dimension_numbers = #tpu.dot_dimension_numbers<[1], [0], [0], [1], [0, 0, 1, 1], [], []>} : vector<16x256xf32>, vector<256x128xf32>, vector<16x128xf32> -> vector<16x128xf32>
    %9 = arith.addf %6, %8 : vector<16x128xf32>
    %c0_7 = arith.constant 0 : index
    %c0_8 = arith.constant 0 : index
    %10 = vector.load %arg6[%c0_7, %c0_8] : memref<16x128xf32, #tpu.memory_space<vmem>>, vector<16x128xf32>
    tpu.vector_store %arg6[%c0_7, %c0_8], %9 {strides = array<i32>} : memref<16x128xf32, #tpu.memory_space<vmem>>, vector<16x128xf32>,
    %c0_i32_9 = arith.constant 0 : i32
    %11 = arith.cmpi eq, %arg1, %c0_i32_9 : i32
    %12 = arith.extui %11 : i1 to i32
    %c0_i32_10 = arith.constant 0 : i32
    %13 = arith.cmpi ne, %12, %c0_i32_10 : i32
    scf.if %13 {
      %c0_11 = arith.constant 0 : index
      %c0_12 = arith.constant 0 : index
      %14 = vector.load %arg6[%c0_11, %c0_12] : memref<16x128xf32, #tpu.memory_space<vmem>>, vector<16x128xf32>
      %c0_13 = arith.constant 0 : index
      %c0_14 = arith.constant 0 : index
      %15 = vector.load %arg4[%c0_13, %c0_14] : memref<1x128xf32, #tpu.memory_space<vmem>>, vector<1x128xf32>
      %16 = vector.broadcast %15 : vector<1x128xf32> to vector<16x128xf32>
      %17 = arith.addf %14, %16 : vector<16x128xf32>
      %c0_15 = arith.constant 0 : index
      %c0_16 = arith.constant 0 : index
      %18 = vector.load %arg5[%c0_15, %c0_16] : memref<16x128xf32, #tpu.memory_space<vmem>>, vector<16x128xf32>
      tpu.vector_store %arg5[%c0_15, %c0_16], %17 {strides = array<i32>} : memref<16x128xf32, #tpu.memory_space<vmem>>, vector<16x128xf32>,
    } else {
    }
    return
  }
  func.func @transform_0(%arg0: i32, %arg1: i32) -> (i32, i32) {
    %c0_i32 = arith.constant 0 : i32
    return %arg0, %arg1 : i32, i32
  }
  func.func @transform_1(%arg0: i32, %arg1: i32) -> (i32, i32) {
    %c0_i32 = arith.constant 0 : i32
    %c0_i32_0 = arith.constant 0 : i32
    return %arg1, %c0_i32 : i32, i32
  }
  func.func @transform_2(%arg0: i32, %arg1: i32) -> (i32, i32) {
    %c0_i32 = arith.constant 0 : i32
    %c0_i32_0 = arith.constant 0 : i32
    %c0_i32_1 = arith.constant 0 : i32
    return %c0_i32, %c0_i32_0 : i32, i32
  }
  func.func @transform_3(%arg0: i32, %arg1: i32) -> (i32, i32) {
    %c0_i32 = arith.constant 0 : i32
    %c0_i32_0 = arith.constant 0 : i32
    return %arg0, %c0_i32 : i32, i32
  }
}

</mosaic_0001>

<bundles_post_ra>
// kernel: tpu_custom_call.1
= control target key start
LH: loop header
LB: loop body
LE: loop exit
PB: predicated region body
PF: predicated region fallthrough
CT: control target
= control target key end

     0   :  { %8 = vsyncpa [#allocation4], 0  ;;  %s341_s0 = inlined_call_operand.hbm [shape: f32[16,256], index: 0, kind: input, shape index: {}]   ;;  %s342_s1 = inlined_call_operand.hbm [shape: f32[256,128], index: 1, kind: input, shape index: {}]   ;;  %s343_s2 = inlined_call_operand.vmem [shape: f32[1,128], index: 2, kind: input, shape index: {}]   ;;  %s344_s3 = inlined_call_operand.hbm [shape: f32[16,128], index: 3, kind: output, shape index: {}]  }
   0x1   :  { %9 = vsyncpa [#allocation7], 0 }
   0x2   :  { %10 = vsyncpa [#allocation5], 0  ;;  %s15_s14 = sshll.u32 %s341_s0, 4  ;;  %s296_s15 = smov [#allocation3]   ;;  %s16_s14 = int_to_ptr.hbm [resolvable:$true] %s15_s14 }
   0x3   :  { %s17_s16 = sshll.u32 %s296_s15, 4  ;;  %s28_s19 = sshll.u32 %s342_s1, 4  ;;  %s18_s16 = int_to_ptr.vmem [resolvable:$true] %s17_s16  ;;  %s29_s19 = int_to_ptr.hbm [resolvable:$true] %s28_s19 }
   0x4   :  { %s297_s20 = smov 256   ;;  %s298_s21 = smov 16  }
   0x5   :  { %23 = dma.hbm_to_vmem [thread:$0]  %s16_s14, 512, %s18_s16, [#allocation4], %s297_s20, %s297_s20, %s298_s21  }
   0x6   :  { %s299_s22 = smov [#allocation6]   ;;  %s300_s24 = smov 128  }
   0x7   :  { %s30_s23 = sshll.u32 %s299_s22, 4  ;;  %s301_s25 = smov 8   ;;  %s31_s23 = int_to_ptr.vmem [resolvable:$true] %s30_s23 }
   0x8   :  { %36 = dma.hbm_to_vmem [thread:$0]  %s29_s19, 4096, %s31_s23, [#allocation7], %s300_s24, %s300_s24, %s301_s25  }
   0x9   :  { %290 = dma.done.wait [#allocation4], 512  }
   0xa   :  { %291 = vsyncadd [#allocation4], 4294966784 }
   0xb   :  { %292 = dma.done.wait [#allocation7], 4096  }
   0xc   :  { %293 = vsyncadd [#allocation7], 4294963200  ;;  %v78_v0 = vld [vmem:[#allocation6 + $0x78] sm:$0xff]  ;;  %v77_v2 = vld [vmem:[#allocation6 + $0x70] sm:$0xff]  ;;  %s302_s26 = smov [#allocation8]   ;;  %s164_s30 = sshll.u32 %s344_s3, 4  ;;  %s165_s30 = int_to_ptr.hbm [resolvable:$true] %s164_s30 }
   0xd   :  { %v94_v1 = vld [vmem:[#allocation6 + $0xf8] sm:$0xff]  ;;  %178 = vmatpush.msra.mxu2 %v78_v0  ;;  %v93_v3 = vld [vmem:[#allocation6 + $0xf0] sm:$0xff]  ;;  %v76_v4 = vld [vmem:[#allocation6 + $0x68] sm:$0xff]  ;;  %95 = vmatpush.msra.mxu0 %v78_v0  ;;  %s162_s27 = sshll.u32 %s302_s26, 4  ;;  %s163_s27 = int_to_ptr.vmem [resolvable:$true] %s162_s27 }
   0xe   :  { %194 = vmatpush.msra.mxu3 %v94_v1  ;;  %v92_v5 = vld [vmem:[#allocation6 + $0xe8] sm:$0xff]  ;;  %118 = vmatpush.msra.mxu1 %v94_v1  ;;  %v75_v6 = vld [vmem:[#allocation6 + $0x60] sm:$0xff]  ;;  %v74_v8 = vld [vmem:[#allocation6 + $0x58] sm:$0xff] }
   0xf   :  { %179 = vmatpush.msra.mxu2 %v77_v2  ;;  %v91_v7 = vld [vmem:[#allocation6 + $0xe0] sm:$0xff]  ;;  %96 = vmatpush.msra.mxu0 %v77_v2  ;;  %v90_v9 = vld [vmem:[#allocation6 + $0xd8] sm:$0xff]  ;;  %v73_v10 = vld [vmem:[#allocation6 + $0x50] sm:$0xff] }
  0x10   :  { %195 = vmatpush.msra.mxu3 %v93_v3  ;;  %119 = vmatpush.msra.mxu1 %v93_v3  ;;  %v89_v11 = vld [vmem:[#allocation6 + $0xd0] sm:$0xff]  ;;  %v72_v12 = vld [vmem:[#allocation6 + $0x48] sm:$0xff]  ;;  %v71_v14 = vld [vmem:[#allocation6 + $0x40] sm:$0xff] }
  0x11   :  { %180 = vmatpush.msra.mxu2 %v76_v4  ;;  %97 = vmatpush.msra.mxu0 %v76_v4  ;;  %v88_v13 = vld [vmem:[#allocation6 + $0xc8] sm:$0xff]  ;;  %v87_v15 = vld [vmem:[#allocation6 + $0xc0] sm:$0xff]  ;;  %v70_v16 = vld [vmem:[#allocation6 + $0x38] sm:$0xff] }
  0x12   :  { %196 = vmatpush.msra.mxu3 %v92_v5  ;;  %120 = vmatpush.msra.mxu1 %v92_v5  ;;  %v86_v17 = vld [vmem:[#allocation6 + $0xb8] sm:$0xff]  ;;  %v69_v18 = vld [vmem:[#allocation6 + $0x30] sm:$0xff]  ;;  %v68_v20 = vld [vmem:[#allocation6 + $0x28] sm:$0xff] }
  0x13   :  { %181 = vmatpush.msra.mxu2 %v75_v6  ;;  %98 = vmatpush.msra.mxu0 %v75_v6  ;;  %v85_v19 = vld [vmem:[#allocation6 + $0xb0] sm:$0xff]  ;;  %v84_v21 = vld [vmem:[#allocation6 + $0xa8] sm:$0xff]  ;;  %v67_v22 = vld [vmem:[#allocation6 + $0x20] sm:$0xff] }
  0x14   :  { %197 = vmatpush.msra.mxu3 %v91_v7  ;;  %121 = vmatpush.msra.mxu1 %v91_v7  ;;  %v83_v23 = vld [vmem:[#allocation6 + $0xa0] sm:$0xff]  ;;  %v66_v24 = vld [vmem:[#allocation6 + $0x18] sm:$0xff]  ;;  %v65_v26 = vld [vmem:[#allocation6 + $0x10] sm:$0xff] }
  0x15   :  { %182 = vmatpush.msra.mxu2 %v74_v8  ;;  %99 = vmatpush.msra.mxu0 %v74_v8  ;;  %v82_v25 = vld [vmem:[#allocation6 + $0x98] sm:$0xff]  ;;  %v81_v27 = vld [vmem:[#allocation6 + $0x90] sm:$0xff]  ;;  %v64_v30 = vld [vmem:[#allocation6 + $0x8] sm:$0xff] }
  0x16   :  { %198 = vmatpush.msra.mxu3 %v90_v9  ;;  %122 = vmatpush.msra.mxu1 %v90_v9  ;;  %v55_v28 = vld [vmem:[#allocation3 + $0x10] sm:$0xff]  ;;  %v56_v29 = vld [vmem:[#allocation3 + $0x18] sm:$0xff]  ;;  %v80_v31 = vld [vmem:[#allocation6 + $0x88] sm:$0xff] }
  0x17   :  { %183 = vmatpush.msra.mxu2 %v73_v10  ;;  %100 = vmatpush.msra.mxu0 %v73_v10  ;;  %v53_v32 = vld [vmem:[#allocation3] sm:$0xff]  ;;  %v54_v33 = vld [vmem:[#allocation3 + $0x8] sm:$0xff]  ;;  %v59_v36 = vmax.f32 %v55_v28, 0.0  ;;  %v60_v37 = vmax.f32 %v56_v29, 0.0 }
  0x18   :  { %199 = vmatpush.msra.mxu3 %v89_v11  ;;  %123 = vmatpush.msra.mxu1 %v89_v11  ;;  %v63_v34 = vld [vmem:[#allocation6] sm:$0xff]  ;;  %v57_v38 = vmax.f32 %v53_v32, 0.0  ;;  %v58_v39 = vmax.f32 %v54_v33, 0.0 }
  0x19   :  { %184 = vmatpush.msra.mxu2 %v72_v12  ;;  %101 = vmatpush.msra.mxu0 %v72_v12  ;;  %v79_v35 = vld [vmem:[#allocation6 + $0x80] sm:$0xff] }
  0x1a   :  { %200 = vmatpush.msra.mxu3 %v88_v13  ;;  %124 = vmatpush.msra.mxu1 %v88_v13  ;;  %v217_v40 = vld [vmem:[%s343_s2] ss:$0 sm:$0xff] }
  0x1b   :  { %185 = vmatpush.msra.mxu2 %v71_v14  ;;  %102 = vmatpush.msra.mxu0 %v71_v14 }
  0x1c   :  { %201 = vmatpush.msra.mxu3 %v87_v15  ;;  %125 = vmatpush.msra.mxu1 %v87_v15 }
  0x1d   :  { %186 = vmatpush.msra.mxu2 %v70_v16  ;;  %103 = vmatpush.msra.mxu0 %v70_v16 }
  0x1e   :  { %202 = vmatpush.msra.mxu3 %v86_v17  ;;  %126 = vmatpush.msra.mxu1 %v86_v17 }
  0x1f   :  { %187 = vmatpush.msra.mxu2 %v69_v18  ;;  %104 = vmatpush.msra.mxu0 %v69_v18 }
  0x20   :  { %203 = vmatpush.msra.mxu3 %v85_v19  ;;  %127 = vmatpush.msra.mxu1 %v85_v19 }
  0x21   :  { %188 = vmatpush.msra.mxu2 %v68_v20  ;;  %105 = vmatpush.msra.mxu0 %v68_v20 }
  0x22   :  { %204 = vmatpush.msra.mxu3 %v84_v21  ;;  %128 = vmatpush.msra.mxu1 %v84_v21 }
  0x23   :  { %189 = vmatpush.msra.mxu2 %v67_v22  ;;  %106 = vmatpush.msra.mxu0 %v67_v22 }
  0x24   :  { %205 = vmatpush.msra.mxu3 %v83_v23  ;;  %129 = vmatpush.msra.mxu1 %v83_v23 }
  0x25   :  { %190 = vmatpush.msra.mxu2 %v66_v24  ;;  %107 = vmatpush.msra.mxu0 %v66_v24 }
  0x26   :  { %206 = vmatpush.msra.mxu3 %v82_v25  ;;  %130 = vmatpush.msra.mxu1 %v82_v25 }
  0x27   :  { %191 = vmatpush.msra.mxu2 %v65_v26  ;;  %108 = vmatpush.msra.mxu0 %v65_v26 }
  0x28   :  { %207 = vmatpush.msra.mxu3 %v81_v27  ;;  %131 = vmatpush.msra.mxu1 %v81_v27 }
  0x29   :  { %192 = vmatpush.msra.mxu2 %v64_v30  ;;  %109 = vmatpush.msra.mxu0 %v64_v30 }
  0x2a   :  { %208 = vmatpush.msra.mxu3 %v80_v31  ;;  %132 = vmatpush.msra.mxu1 %v80_v31 }
  0x2b   :  { %193 = vmatpush.msra.mxu2 %v63_v34  ;;  %110 = vmatpush.msra.mxu0 %v63_v34 }
  0x2c   :  { %209 = vmatpush.msra.mxu3 %v79_v35  ;;  %114 = vmatmul.f32.vlgmr.msra.gmra.mxu2 %v59_v36 }
  0x2d   :  { %137 = vmatmul.f32.vlgmr.msra.gmra.mxu3 %v60_v37  ;;  %133 = vmatpush.msra.mxu1 %v79_v35 }
  0x2e   :  { %111 = vmatmul.f32.vlgmr.msra.gmra.mxu0 %v57_v38  ;;  %134 = vmatmul.f32.vlgmr.msra.gmra.mxu1 %v58_v39 }
  0xab   :  { %v112_v41 = vpop.f32.mrf.mxu0  ;;  %v135_v42 = vpop.f32.mrf.mxu1 }
  0xac   :  { %v136_v43 = vadd.f32 %v135_v42, %v112_v41 }
  0xae   :  { %v154_v44 = vadd.f32 %v217_v40, %v136_v43 }
  0xaf   :  { %v115_v45 = vpop.f32.mrf.mxu2 }
  0xb0   :  { %v138_v46 = vpop.f32.mrf.mxu3  ;;  %156 = vst [vmem:[#allocation8] sm:$0xff] %v154_v44 }
  0xb1   :  { %v139_v47 = vadd.f32 %v138_v46, %v115_v45 }
  0xb3   :  { %v155_v48 = vadd.f32 %v217_v40, %v139_v47 }
  0xb5   :  { %157 = vst [vmem:[#allocation8 + $0x8] sm:$0xff] %v155_v48 }
  0xb6   :  { %170 = dma.vmem_to_hbm [thread:$0]  %s163_s27, 256, %s165_s30, [#allocation5], %s300_s24, %s300_s24, %s301_s25  }
  0xb7   :  { %294 = dma.done.wait [#allocation5], 256  }
  0xb8   :  { %295 = vsyncadd [#allocation5], 4294967040 }
  0xb9   :  { %175 = vsyncpa [#allocation4], 1 }
  0xba   :  { %176 = vsyncpa [#allocation7], 1 }
  0xbb   :  { %177 = vsyncpa [#allocation5], 1 }

</bundles_post_ra>
